<compile_context>
chip_gen: v7x
topology: tpu7x:2x2x1
jax: 0.10.0
libtpu: 0.0.40
codegen_flags: <defaults>
</compile_context>

<pallas_src>
import functools
import math

import jax
import jax.numpy as jnp
from jax.experimental import pallas as pl
from jax.experimental.pallas import tpu as pltpu


def _time2vec_kernel(tau_ref, w_ref, b_ref, o_ref, *, n_per_row):
    # Fused matmul + bias, f32 accumulation on the MXU.
    y = jnp.dot(tau_ref[...], w_ref[...], preferred_element_type=jnp.float32)
    y = y + b_ref[...]                      # (1, Np) bias broadcasts over rows
    # Linear-column mask from a single (1, Np) iota row; broadcasts over
    # sublanes inside the where (much cheaper than a full-tile iota + mod).
    col = jax.lax.broadcasted_iota(jnp.int32, (1, y.shape[1]), 1)
    is_linear = (col % n_per_row) == 0
    if o_ref.dtype == jnp.bfloat16:
        # Optional bf16 path: halves sin VALU cost and output HBM traffic.
        y = y.astype(jnp.bfloat16)
    o_ref[...] = jnp.where(is_linear, y, jnp.sin(y)).astype(o_ref.dtype)


def _resident_spec(shape):
    """Grid-invariant operand: constant index map, single VMEM buffer."""
    index_map = lambda *_: (0,) * len(shape)
    try:
        return pl.BlockSpec(shape, index_map, pipeline_mode=pl.Buffered(1))
    except (TypeError, AttributeError):
        # Older JAX without pipeline_mode: fall back to the default (double
        # buffer) — tiny VMEM cost, no correctness impact.
        return pl.BlockSpec(shape, index_map)


def _time2vec_2d(tau2d, w, b, *, tm_packed=4096, out_dtype=None):
    """tau2d: (M, K), w: (K, N) fused weight, b: (N,) fused bias -> (M, N)."""
    M, K = tau2d.shape
    Kw, N = w.shape
    assert K == Kw and b.shape == (N,)
    out_dtype = tau2d.dtype if out_dtype is None else jnp.dtype(out_dtype)
    if M == 0:
        return jnp.zeros((0, N), dtype=out_dtype)

    in_itemsize = jnp.dtype(tau2d.dtype).itemsize
    out_itemsize = jnp.dtype(out_dtype).itemsize

    # ---- Lane-dense column handling -------------------------------------
    n_cols = N
    pad_cols = 0
    group = 128 // math.gcd(128, n_cols)          # rows packed per output row
    if group > 4:
        # Awkward out_features: zero-pad fused weight/bias columns up to a
        # multiple of 32 so the packing group stays <= 4; padded columns are
        # sliced off after the kernel (they only cost a few wasted sin lanes).
        n_cols = ((N + 31) // 32) * 32
        pad_cols = n_cols - N
        w = jnp.pad(w, ((0, 0), (0, pad_cols)))
        b = jnp.pad(b, ((0, pad_cols),))
        group = 128 // math.gcd(128, n_cols)
    Kp, Np = group * K, group * n_cols            # Np is a multiple of 128

    # ---- Row packing (pad at most group-1 rows; usually a free view) ----
    pad_rows = (-M) % group
    if pad_rows:
        tau2d = jnp.pad(tau2d, ((0, pad_rows), (0, 0)))
    mp = (M + pad_rows) // group                  # packed row count
    tau_packed = tau2d.reshape(mp, Kp)            # row-major view, no copy

    # ---- Fused block-diagonal weight / tiled bias (tiny, resident) ------
    w_big = jnp.kron(jnp.eye(group, dtype=w.dtype), w)     # (Kp, Np)
    b_big = jnp.tile(b, group)[None, :]                     # (1, Np)

    # ---- Tile size: as big as the VMEM budget allows, but keep >= 2 grid
    # steps when splittable so dimension_semantics=("parallel",) can feed
    # both v7x TensorCores. --------------------------------------------
    bytes_per_row = 2 * (Kp * in_itemsize + Np * out_itemsize)  # double-buffered
    vmem_budget = 24 * 1024 * 1024
    tm_cap = max(8, (vmem_budget // bytes_per_row) // 8 * 8)
    if mp <= 16:
        tm = mp                                   # single full-dim block
    else:
        half = pl.cdiv(pl.cdiv(mp, 2), 8) * 8     # >= 2 grid steps
        tm = max(8, min(tm_packed, tm_cap, half))
    grid_m = pl.cdiv(mp, tm)                      # partial last block is masked

    cost = pl.CostEstimate(
        flops=2 * mp * Kp * Np + mp * Np,
        transcendentals=mp * Np,
        bytes_accessed=in_itemsize * (mp * Kp + Kp * Np + Np)
        + out_itemsize * mp * Np,
    )

    out_packed = pl.pallas_call(
        functools.partial(_time2vec_kernel, n_per_row=n_cols),
        out_shape=jax.ShapeDtypeStruct((mp, Np), out_dtype),
        grid=(grid_m,),
        in_specs=[
            pl.BlockSpec((tm, Kp), lambda i: (i, 0)),   # streamed row tiles
            _resident_spec((Kp, Np)),                   # resident fused weight
            _resident_spec((1, Np)),                    # resident fused bias
        ],
        out_specs=pl.BlockSpec((tm, Np), lambda i: (i, 0)),
        compiler_params=pltpu.CompilerParams(
            dimension_semantics=("parallel",),
            vmem_limit_bytes=32 * 1024 * 1024,
        ),
        cost_estimate=cost,
    )(tau_packed, w_big, b_big)

    out = out_packed.reshape(mp * group, n_cols)    # free row-major view
    if pad_cols:
        out = out[:, :N]
    if pad_rows:
        out = out[:M]
    return out


def time2vec(tau, w0, b0, wi, bi, *, tm_packed=4096, out_dtype=None):
    """Time2Vec forward.

    tau: (..., in_features)
    w0: (in_features, 1), b0: (1,)                            -- the `l0` Linear
    wi: (in_features, out_features-1), bi: (out_features-1,)  -- the `li` Linear
    returns: (..., out_features)
    """
    in_features = tau.shape[-1]
    out_features = wi.shape[1] + 1
    # Fuse the two Linears: column 0 = linear term, columns 1.. = sin terms.
    w = jnp.concatenate([w0, wi], axis=1)        # (K, N)
    b = jnp.concatenate([b0, bi], axis=0)        # (N,)
    tau2d = tau.reshape(-1, in_features)
    out2d = _time2vec_2d(tau2d, w, b, tm_packed=tm_packed, out_dtype=out_dtype)
    return out2d.reshape(*tau.shape[:-1], out_features)


def time2vec_reference(tau, w0, b0, wi, bi):
    time_linear = tau @ w0 + b0
    time_sin = jnp.sin(tau @ wi + bi)
    return jnp.concatenate([time_linear, time_sin], axis=-1)


if __name__ == "__main__":
    batch, seq, in_features, out_features = 2, 8, 16, 32

    key = jax.random.PRNGKey(0)
    k_tau, k_w0, k_b0, k_wi, k_bi, k_tau2 = jax.random.split(key, 6)

    # Deterministic parameter init (mirrors nn.Linear's uniform(-1/sqrt(in), 1/sqrt(in)))
    bound = 1.0 / (in_features ** 0.5)
    w0 = jax.random.uniform(k_w0, (in_features, 1), jnp.float32, -bound, bound)
    b0 = jax.random.uniform(k_b0, (1,), jnp.float32, -bound, bound)
    wi = jax.random.uniform(k_wi, (in_features, out_features - 1), jnp.float32, -bound, bound)
    bi = jax.random.uniform(k_bi, (out_features - 1,), jnp.float32, -bound, bound)

    # Case 1: small, evenly packed shape (no row padding, no slices).
    tau = jax.random.normal(k_tau, (batch, seq, in_features), dtype=jnp.float32)
    out = time2vec(tau, w0, b0, wi, bi)
    jax.block_until_ready(out)
    ref = time2vec_reference(tau, w0, b0, wi, bi)
    assert out.shape == (batch, seq, out_features)
    assert jnp.allclose(out, ref, atol=1e-5, rtol=1e-5), "mismatch vs reference (case 1)"

    # Case 2: row count not divisible by the lane-dense group (row-pad path).
    tau2 = jax.random.normal(k_tau2, (3, 7, in_features), dtype=jnp.float32)
    out2 = time2vec(tau2, w0, b0, wi, bi)
    jax.block_until_ready(out2)
    ref2 = time2vec_reference(tau2, w0, b0, wi, bi)
    assert out2.shape == (3, 7, out_features)
    assert jnp.allclose(out2, ref2, atol=1e-5, rtol=1e-5), "mismatch vs reference (case 2)"

    # Case 3: awkward out_features (33) -> exercises the column-pad fallback
    # (no masked stores; extra columns sliced off in the wrapper).
    out_features3 = 33
    k_wi3, k_bi3 = jax.random.split(k_bi, 2)
    wi3 = jax.random.uniform(k_wi3, (in_features, out_features3 - 1), jnp.float32, -bound, bound)
    bi3 = jax.random.uniform(k_bi3, (out_features3 - 1,), jnp.float32, -bound, bound)
    out3 = time2vec(tau2, w0, b0, wi3, bi3)
    jax.block_until_ready(out3)
    ref3 = time2vec_reference(tau2, w0, b0, wi3, bi3)
    assert out3.shape == (3, 7, out_features3)
    assert jnp.allclose(out3, ref3, atol=1e-5, rtol=1e-5), "mismatch vs reference (case 3)"

    print("KERNEL_OK")
</pallas_src>

<mosaic_0001>
module attributes {stable_mosaic.version = 11 : i64} {
  func.func @_time2vec_kernel(%arg0: i32, %arg1: memref<4x64xf32, #tpu.memory_space<vmem>>, %arg2: memref<64x128xf32, #tpu.memory_space<vmem>>, %arg3: memref<1x128xf32, #tpu.memory_space<vmem>>, %arg4: memref<4x128xf32, #tpu.memory_space<vmem>>) attributes {dimension_semantics = [#tpu.dimension_semantics<parallel>], iteration_bounds = array<i64: 1>, scalar_prefetch = 0 : i64, scratch_operands = 0 : i64, tpu.core_type = #tpu.core_type<tc>, window_params = [{transform_indices = @transform_0, window_bounds = array<i64: 4, 64>}, {pipeline_mode = #tpu.pipeline_mode<synchronous>, transform_indices = @transform_1, window_bounds = array<i64: 64, 128>}, {pipeline_mode = #tpu.pipeline_mode<synchronous>, transform_indices = @transform_2, window_bounds = array<i64: 1, 128>}, {transform_indices = @transform_3, window_bounds = array<i64: 4, 128>}]} {
    %c0 = arith.constant 0 : index
    %c0_0 = arith.constant 0 : index
    %0 = vector.load %arg1[%c0, %c0_0] : memref<4x64xf32, #tpu.memory_space<vmem>>, vector<4x64xf32>
    %c0_1 = arith.constant 0 : index
    %c0_2 = arith.constant 0 : index
    %1 = vector.load %arg2[%c0_1, %c0_2] : memref<64x128xf32, #tpu.memory_space<vmem>>, vector<64x128xf32>
    %cst = arith.constant dense<0.000000e+00> : vector<4x128xf32>
    %2 = tpu.matmul %0, %1, %cst {dimension_numbers = #tpu.dot_dimension_numbers<[1], [0], [0], [1], [0, 0, 1, 1], [], []>} : vector<4x64xf32>, vector<64x128xf32>, vector<4x128xf32> -> vector<4x128xf32>
    %c0_3 = arith.constant 0 : index
    %c0_4 = arith.constant 0 : index
    %3 = vector.load %arg3[%c0_3, %c0_4] : memref<1x128xf32, #tpu.memory_space<vmem>>, vector<1x128xf32>
    %4 = vector.broadcast %3 : vector<1x128xf32> to vector<4x128xf32>
    %5 = arith.addf %2, %4 : vector<4x128xf32>
    %6 = tpu.iota {dimensions = array<i32: 1>} : vector<1x128xi32>
    %c32_i32 = arith.constant 32 : i32
    %c0_i32 = arith.constant 0 : i32
    %7 = arith.cmpi eq, %c32_i32, %c0_i32 : i32
    %c1_i32 = arith.constant 1 : i32
    %8 = arith.select %7, %c1_i32, %c32_i32 : i32
    %9 = vector.broadcast %8 : i32 to vector<1x128xi32>
    %10 = arith.remsi %6, %9 : vector<1x128xi32>
    %c0_i32_5 = arith.constant 0 : i32
    %11 = vector.broadcast %c0_i32_5 : i32 to vector<1x128xi32>
    %12 = arith.cmpi ne, %10, %11 : vector<1x128xi32>
    %c0_i32_6 = arith.constant 0 : i32
    %13 = vector.broadcast %c0_i32_6 : i32 to vector<1x128xi32>
    %14 = arith.cmpi slt, %10, %13 : vector<1x128xi32>
    %c0_i32_7 = arith.constant 0 : i32
    %15 = arith.cmpi slt, %8, %c0_i32_7 : i32
    %16 = vector.broadcast %15 : i1 to vector<1x128xi1>
    %17 = vector.broadcast %16 : vector<1x128xi1> to vector<1x128xi1>
    %18 = arith.xori %14, %17 : vector<1x128xi1>
    %19 = arith.andi %18, %12 : vector<1x128xi1>
    %20 = vector.broadcast %8 : i32 to vector<1x128xi32>
    %21 = arith.addi %10, %20 : vector<1x128xi32>
    %22 = arith.select %19, %21, %10 : vector<1x128xi1>, vector<1x128xi32>
    %c0_i32_8 = arith.constant 0 : i32
    %23 = vector.broadcast %c0_i32_8 : i32 to vector<1x128xi32>
    %24 = arith.cmpi eq, %22, %23 : vector<1x128xi32>
    %25 = math.sin %5 : vector<4x128xf32>
    %26 = vector.shape_cast %24 : vector<1x128xi1> to vector<1x128xi1>
    %27 = vector.broadcast %26 : vector<1x128xi1> to vector<4x128xi1>
    %28 = arith.select %27, %5, %25 : vector<4x128xi1>, vector<4x128xf32>
    %c0_9 = arith.constant 0 : index
    %c0_10 = arith.constant 0 : index
    %29 = vector.load %arg4[%c0_9, %c0_10] : memref<4x128xf32, #tpu.memory_space<vmem>>, vector<4x128xf32>
    tpu.vector_store %arg4[%c0_9, %c0_10], %28 {strides = array<i32>} : memref<4x128xf32, #tpu.memory_space<vmem>>, vector<4x128xf32>,
    return
  }
  func.func @transform_0(%arg0: i32) -> (i32, i32) {
    %c0_i32 = arith.constant 0 : i32
    %c0_i32_0 = arith.constant 0 : i32
    return %arg0, %c0_i32 : i32, i32
  }
  func.func @transform_1(%arg0: i32) -> (i32, i32) {
    %c0_i32 = arith.constant 0 : i32
    %c0_i32_0 = arith.constant 0 : i32
    %c0_i32_1 = arith.constant 0 : i32
    return %c0_i32, %c0_i32_0 : i32, i32
  }
  func.func @transform_2(%arg0: i32) -> (i32, i32) {
    %c0_i32 = arith.constant 0 : i32
    %c0_i32_0 = arith.constant 0 : i32
    %c0_i32_1 = arith.constant 0 : i32
    return %c0_i32, %c0_i32_0 : i32, i32
  }
  func.func @transform_3(%arg0: i32) -> (i32, i32) {
    %c0_i32 = arith.constant 0 : i32
    %c0_i32_0 = arith.constant 0 : i32
    return %arg0, %c0_i32 : i32, i32
  }
}

</mosaic_0001>

<bundles_post_ra>
// kernel: tpu_custom_call.1
= control target key start
LH: loop header
LB: loop body
LE: loop exit
PB: predicated region body
PF: predicated region fallthrough
CT: control target
= control target key end

     0   :  { %8 = vsyncpa [#allocation3], 0  ;;  %s512_s0 = inlined_call_operand.hbm [shape: f32[4,64], index: 0, kind: input, shape index: {}]   ;;  %s513_s1 = inlined_call_operand.hbm [shape: f32[64,128], index: 1, kind: input, shape index: {}]   ;;  %s514_s2 = inlined_call_operand.vmem [shape: f32[1,128], index: 2, kind: input, shape index: {}]   ;;  %s515_s3 = inlined_call_operand.hbm [shape: f32[4,128], index: 3, kind: output, shape index: {}]  }
   0x1   :  { %9 = vsyncpa [#allocation6], 0 }
   0x2   :  { %10 = vsyncpa [#allocation4], 0  ;;  %s410_s12 = smov [#allocation2]   ;;  %s411_s14 = smov [#allocation5]  }
   0x3   :  { %s17_s13 = sshll.u32 %s410_s12, 4  ;;  %s26_s15 = sshll.u32 %s411_s14, 4  ;;  %s18_s13 = int_to_ptr.vmem [resolvable:$true] %s17_s13  ;;  %s444_s15 = int_to_ptr.vmem [resolvable:$true] %s26_s15 }
   0x4   :  { %s338_s18 = scalar_lea.hbm %s512_s0, 64 }
   0x5   :  { %p339_p0 = scmp.ne.s32.totalorder %s512_s0, %s338_s18  ;;  %p342_p1 = scmp.lt.u32.totalorder %s338_s18, %s512_s0 }
   0x7   :  { %p344_p2 = pnand %p342_p1, %p339_p0 }
   0x9   :  { %347 = shalt.err (!%p344_p2)
}
   0xa   :  { %s348_s23 = scalar_lea.vmem %s18_s13, 64  ;;  %p353_p4 = scmp.lt.s32.totalorder %s18_s13, %s18_s13 }
   0xb   :  { %p349_p3 = scmp.ne.s32.totalorder %s18_s13, %s348_s23  ;;  %p354_p5 = scmp.lt.s32.totalorder %s348_s23, %s348_s23 }
   0xd   :  { %p355_p6 = por %p354_p5, %p353_p4 }
   0xf   :  { %p356_p7 = pnand %p355_p6, %p349_p3 }
  0x11   :  { %359 = shalt.err (!%p356_p7)
}
  0x12   :  { %20 = dma.hbm_to_vmem [thread:$0]  %s512_s0, 64, %s18_s13, [#allocation3]  }
  0x13   :  { %s360_s28 = scalar_lea.hbm %s513_s1, 1024 }
  0x14   :  { %p361_p8 = scmp.ne.s32.totalorder %s513_s1, %s360_s28  ;;  %p364_p9 = scmp.lt.u32.totalorder %s360_s28, %s513_s1 }
  0x16   :  { %p366_p10 = pnand %p364_p9, %p361_p8 }
  0x18   :  { %369 = shalt.err (!%p366_p10)
}
  0x19   :  { %s370_s6 = scalar_lea.vmem %s444_s15, 1024  ;;  %p375_p12 = scmp.lt.s32.totalorder %s444_s15, %s444_s15 }
  0x1a   :  { %p371_p11 = scmp.ne.s32.totalorder %s444_s15, %s370_s6  ;;  %p376_p13 = scmp.lt.s32.totalorder %s370_s6, %s370_s6 }
  0x1c   :  { %p377_p0 = por %p376_p13, %p375_p12 }
  0x1e   :  { %p378_p1 = pnand %p377_p0, %p371_p11 }
  0x20   :  { %381 = shalt.err (!%p378_p1)
}
  0x21   :  { %s412_s0 = smov 128   ;;  %s413_s7 = smov 8  }
  0x22   :  { %32 = dma.hbm_to_vmem [thread:$0]  %s513_s1, 1024, %s444_s15, [#allocation6], %s412_s0, %s412_s0, %s413_s7  }
  0x23   :  { %404 = dma.done.wait [#allocation3], 64  }
  0x24   :  { %405 = vsyncadd [#allocation3], 4294967232 }
  0x25   :  { %406 = dma.done.wait [#allocation6], 1024  }
  0x26   :  { %407 = vsyncadd [#allocation6], 4294966272  ;;  %v414_v0 = vmov 0.0|0.0   ;;  %vm415_vm0 = vmmov 0   ;;  %v416_v1 = vmov 0.0   ;;  %v42_v2 = vld [vmem:[#allocation5] sm:$0xff] }
  0x27   :  { %304 = vmatprep.subr.bf16.mxu0 %v414_v0  ;;  %301 = vmatprep.mubr.msk.f32.mxu0 %vm415_vm0, %v416_v1  ;;  %v43_v3 = vld [vmem:[#allocation5 + $0x8] sm:$0xff]  ;;  %v44_v4 = vld [vmem:[#allocation5 + $0x10] sm:$0xff]  ;;  %v45_v6 = vld [vmem:[#allocation5 + $0x18] sm:$0xff]  ;;  %vm57_vm1 = vcmask 523264   ;;  %v417_v30 = vmov 2102212464  }
  0x28   :  { %v305_v5 = vpack.c.bf16 %v43_v3, %v42_v2  ;;  %v308_v7 = vpack.c.bf16 %v45_v6, %v44_v4  ;;  %v46_v8 = vld [vmem:[#allocation5 + $0x20] sm:$0xff]  ;;  %v47_v9 = vld [vmem:[#allocation5 + $0x28] sm:$0xff]  ;;  %v48_v11 = vld [vmem:[#allocation5 + $0x30] sm:$0xff]  ;;  %v418_v32 = vmov 920167782  }
  0x29   :  { %v311_v10 = vpack.c.bf16 %v47_v9, %v46_v8  ;;  %v49_v12 = vld [vmem:[#allocation5 + $0x38] sm:$0xff]  ;;  %v419_v36 = vmov 1326507024   ;;  %v420_v38 = vmov 683565275  }
  0x2a   :  { %306 = vmatpush3.bf16.msra.mxu0 %v305_v5  ;;  %v314_v13 = vpack.c.bf16 %v49_v12, %v48_v11  ;;  %v41_v14 = vld [vmem:[#allocation2] sm:$0xf]  ;;  %v421_v40 = vmov 2475754826   ;;  %v422_v43 = vmov 2131351028  }
  0x2b   :  { %307 = vmatprep.subr.bf16.mxu0 %v414_v0  ;;  %v270_v15 = vld [vmem:[%s514_s2] ss:$0 sm:$0xff]  ;;  %s423_s2 = smov [#allocation7]  }
  0x2c   :  { %s260_s11 = sshll.u32 %s423_s2, 4  ;;  %s261_s11 = int_to_ptr.vmem [resolvable:$true] %s260_s11 }
  0x2d   :  { %s382_s12 = scalar_lea.vmem %s261_s11, 64  ;;  %p387_p3 = scmp.lt.s32.totalorder %s261_s11, %s261_s11 }
  0x2e   :  { %309 = vmatpush3.bf16.msra.mxu0 %v308_v7  ;;  %p383_p2 = scmp.ne.s32.totalorder %s261_s11, %s382_s12  ;;  %p388_p4 = scmp.lt.s32.totalorder %s382_s12, %s382_s12 }
  0x2f   :  { %310 = vmatprep.subr.bf16.mxu0 %v414_v0 }
  0x30   :  { %p389_p5 = por %p388_p4, %p387_p3 }
  0x32   :  { %312 = vmatpush3.bf16.msra.mxu0 %v311_v10  ;;  %p390_p6 = pnand %p389_p5, %p383_p2 }
  0x33   :  { %313 = vmatprep.subr.bf16.mxu0 %v414_v0 }
  0x36   :  { %315 = vmatpush3.bf16.msra.mxu0 %v314_v13 }
  0x39   :  { %302 = vmatmul.mubr.msk.f32.vlgmr.msra.gmra.mrb[0].mxu0 %vm57_vm1, %v41_v14 }
 0x10c   :  { %v127_v16 = vpop.f32.mrb[0].mxu0 }
 0x10d   :  { %v478_v17 = vadd.f32 %v270_v15, %v127_v16  ;;  %v303_v18 = vpop.f32.mrb[1].mxu0 }
 0x10f   :  { %v149_v19 = vand.u32 2139095040, %v478_v17  ;;  %v146_v20 = vand.u32 2147483647, %v478_v17  ;;  %vm148_vm9 = vcmp.lt.s32.totalorder %v478_v17, 0  ;;  %vm238_vm15 = vweird.f32 %v478_v17 }
 0x111   :  { %v150_v21 = vshrl.u32 %v149_v19, 23  ;;  %v153_v23 = vand.u32 8388607, %v146_v20  ;;  %vm147_vm10 = vcmp.le.f32.partialorder %v146_v20, 0.7853982 }
 0x113   :  { %v272_v22 = vadd.s32 4294967169, %v150_v21  ;;  %v154_v26 = vor.u32 8388608, %v153_v23 }
 0x115   :  { %v156_v24 = vadd.s32 1, %v272_v22  ;;  %v194_v34 = vshll.u32 %v154_v26, 8 }
 0x117   :  { %vm157_vm2 = vcmp.gt.s32.totalorder %v156_v24, 0 }
 0x118   :  { %v158_v25 = vsel %vm157_vm2, %v156_v24, 0 }
 0x119   :  { %v160_v27 = vand.u32 31, %v158_v25  ;;  %v159_v28 = vshrl.u32 %v158_v25, 5 }
 0x11b   :  { %v161_v29 = vsub.s32 32, %v160_v27  ;;  %v172_v31 = vshll.u32 %v417_v30, %v160_v27  ;;  %v175_v33 = vshll.u32 %v418_v32, %v160_v27  ;;  %v163_v39 = vshll.u32 %v420_v38, %v160_v27 }
 0x11c   :  { %v166_v42 = vshll.u32 %v421_v40, %v160_v27  ;;  %v169_v45 = vshll.u32 %v422_v43, %v160_v27  ;;  %vm181_vm3 = vcmp.lt.s32.totalorder %v159_v28, 4  ;;  %vm178_vm4 = vcmp.lt.s32.totalorder %v159_v28, 1 }
 0x11d   :  { %v173_v35 = vshrl.u32 %v418_v32, %v161_v29  ;;  %v176_v37 = vshrl.u32 %v419_v36, %v161_v29  ;;  %v164_v41 = vshrl.u32 %v421_v40, %v161_v29  ;;  %v167_v44 = vshrl.u32 %v422_v43, %v161_v29 }
 0x11e   :  { %v170_v46 = vshrl.u32 %v417_v30, %v161_v29  ;;  %v162_v50 = vshrl.u32 %v420_v38, %v161_v29  ;;  %vm179_vm5 = vcmp.lt.s32.totalorder %v159_v28, 2  ;;  %vm180_vm6 = vcmp.lt.s32.totalorder %v159_v28, 3 }
 0x11f   :  { %v174_v47 = vor.u32 %v173_v35, %v172_v31  ;;  %v177_v48 = vor.u32 %v176_v37, %v175_v33  ;;  %v165_v49 = vor.u32 %v164_v41, %v163_v39  ;;  %v168_v51 = vor.u32 %v167_v44, %v166_v42 }
 0x120   :  { %v171_v52 = vor.u32 %v170_v46, %v169_v45  ;;  %v131_v38 = vlaneseq }
 0x121   :  { %v187_v53 = vsel %vm181_vm3, %v174_v47, 920167782  ;;  %v191_v54 = vsel %vm181_vm3, %v177_v48, 1326507024  ;;  %v186_v56 = vsel %vm178_vm4, %v165_v49, %v168_v51  ;;  %v182_v59 = vsel %vm178_vm4, %v162_v50, %v165_v49 }
 0x122   :  { %v183_v55 = vsel %vm181_vm3, %v171_v52, 2102212464  ;;  %v188_v57 = vsel %vm180_vm6, %v171_v52, %v187_v53  ;;  %v190_v58 = vsel %vm178_vm4, %v168_v51, %v171_v52  ;;  %v192_v62 = vsel %vm180_vm6, %v174_v47, %v191_v54 }
 0x123   :  { %v184_v60 = vsel %vm180_vm6, %v168_v51, %v183_v55  ;;  %v189_v61 = vsel %vm179_vm5, %v186_v56, %v188_v57  ;;  %v193_v63 = vsel %vm179_vm5, %v190_v58, %v192_v62  ;;  %v132_v40 = vand.u32 127, %v131_v38 }
 0x124   :  { %v484_v0 = vmul.u32.u64.low %v194_v34, %v189_v61  ;;  %v485_v1 = vmul.u32.u64.high %v194_v34, %v189_v61, %v484_v0  ;;  %v487_v2 = vmul.u32.u64.low %v194_v34, %v193_v63  ;;  %v488_v3 = vmul.u32.u64.high %v194_v34, %v193_v63, %v487_v2 }
 0x125   :  { %v185_v4 = vsel %vm179_vm5, %v182_v59, %v184_v60  ;;  %v137_v43 = vand.u32 31, %v132_v40 }
 0x126   :  { %v204_v5 = vadd.s32 1, %v485_v1  ;;  %v201_v6 = vmul.u32 %v194_v34, %v185_v4  ;;  %vm203_vm7 = vc.u32 %v488_v3, %v484_v0  ;;  %v202_v19 = vadd.s32 %v484_v0, %v488_v3 }
 0x127   :  { %vm145_vm13 = vcmp.eq.s32.totalorder %v137_v43, 0 }
 0x128   :  { %v205_v7 = vsel %vm203_vm7, %v204_v5, %v485_v1 }
 0x129   :  { %v206_v8 = vadd.s32 %v205_v7, %v201_v6 }
 0x12b   :  { %v207_v9 = vadd.s32 536870912, %v206_v8 }
 0x12d   :  { %v208_v10 = vshrl.u32 %v207_v9, 30 }
 0x12f   :  { %v209_v11 = vshll.u32 %v208_v10, 30  ;;  %v232_v32 = vsub.s32 4, %v208_v10 }
 0x131   :  { %v210_v12 = vsub.s32 %v206_v8, %v209_v11  ;;  %v233_v35 = vsel %vm148_vm9, %v232_v32, %v208_v10 }
 0x132   :  { %v235_v37 = vsel %vm147_vm10, 0, %v233_v35 }
 0x133   :  { %v212_v13 = vsub.s32 0, %v210_v12  ;;  %v239_v39 = vadd.s32 3, %v235_v37 }
 0x135   :  { %v273_v14 = vmin.u32 %v212_v13, %v210_v12  ;;  %v240_v41 = vand.u32 3, %v239_v39 }
 0x137   :  { %v214_v15 = vclz %v273_v14  ;;  %vm245_vm11 = vcmp.eq.s32.totalorder %v240_v41, 2  ;;  %vm242_vm12 = vcmp.eq.s32.totalorder %v240_v41, 0  ;;  %vm241_vm14 = vcmp.lt.s32.totalorder %v240_v41, 2 }
 0x139   :  { %v274_v16 = vadd.s32 4294967294, %v214_v15 }
 0x13b   :  { %vm275_vm8 = vcmp.lt.s32.totalorder %v274_v16, 0 }
 0x13c   :  { %v217_v18 = vsel %vm275_vm8, 0, %v274_v16 }
 0x13d   :  { %v218_v21 = vsub.s32 32, %v217_v18  ;;  %v222_v22 = vsub.s32 4294967266, %v217_v18  ;;  %v219_v23 = vshll.u32 %v210_v12, %v217_v18 }
 0x13f   :  { %v220_v24 = vshrl.u32 %v202_v19, %v218_v21  ;;  %v223_v25 = vadd.s32 127, %v222_v22 }
 0x141   :  { %v221_v26 = vor.u32 %v220_v24, %v219_v23  ;;  %v224_v27 = vshll.u32 %v223_v25, 23 }
 0x143   :  { %v225_v28 = vor.u32 4788187, %v224_v27  ;;  %v228_v30 = vcvt.s32.f32 %v221_v26 }
 0x145   :  { %v226_v29 = vand.u32 2147483647, %v225_v28 }
 0x147   :  { %v229_v31 = vmul.f32 %v228_v30, %v226_v29 }
 0x149   :  { %v230_v33 = vxor.u32 2147483648, %v229_v31 }
 0x14b   :  { %v231_v34 = vsel %vm148_vm9, %v230_v33, %v229_v31 }
 0x14c   :  { %v234_v36 = vsel %vm147_vm10, %v478_v17, %v231_v34 }
 0x14d   :  { %334 = vcosq.f32 %v234_v36 }
 0x14e   :  { %336 = vsinq.f32 %v234_v36 }
 0x157   :  { %v335_v42 = vpop.eup %334 }
 0x158   :  { %v337_v44 = vpop.eup %336  ;;  %v246_v45 = vxor.u32 2147483648, %v335_v42 }
 0x159   :  { %v243_v46 = vxor.u32 2147483648, %v337_v44 }
 0x15a   :  { %v247_v47 = vsel %vm245_vm11, %v246_v45, %v337_v44 }
 0x15b   :  { %v244_v20 = vsel %vm242_vm12, %v335_v42, %v243_v46 }
 0x15c   :  { %v248_v48 = vsel %vm241_vm14, %v244_v20, %v247_v47 }
 0x15d   :  { %v249_v49 = vsel %vm238_vm15, nan, %v248_v48 }
 0x15e   :  { %v252_v50 = vsel %vm145_vm13, %v478_v17, %v249_v49 }
 0x15f   :  { %253 = vst [vmem:[#allocation7] sm:$0xf] %v252_v50 }
 0x160   :  { %393 = shalt.err (!%p390_p6)
}
 0x161   :  { %s394_s15 = scalar_lea.hbm %s515_s3, 64 }
 0x162   :  { %p395_p7 = scmp.ne.s32.totalorder %s515_s3, %s394_s15  ;;  %p398_p8 = scmp.lt.u32.totalorder %s394_s15, %s515_s3 }
 0x164   :  { %p400_p9 = pnand %p398_p8, %p395_p7 }
 0x166   :  { %403 = shalt.err (!%p400_p9)
}
 0x167   :  { %263 = dma.vmem_to_hbm [thread:$0]  %s261_s11, 64, %s515_s3, [#allocation4]  }
 0x168   :  { %408 = dma.done.wait [#allocation4], 64  }
 0x169   :  { %409 = vsyncadd [#allocation4], 4294967232 }
 0x16a   :  { %267 = vsyncpa [#allocation3], 1 }
 0x16b   :  { %268 = vsyncpa [#allocation6], 1 }
 0x16c   :  { %269 = vsyncpa [#allocation4], 1 }

</bundles_post_ra>
